<compile_context>
chip_gen: v7x
topology: tpu7x:2x2x1
jax: 0.10.0
libtpu: 0.0.40
codegen_flags: <defaults>
</compile_context>

<pallas_src>
import functools

import jax
import jax.numpy as jnp
from jax import lax
from jax.experimental import pallas as pl
from jax.experimental.pallas import tpu as pltpu

LANES = 128
MAX_TILE_ROWS = 2048  # (2048, 128) f32 block = 1 MiB per input per buffer


def _combined_loss_kernel(x_ref, y_ref, out_ref, sq_acc, abs_acc, *,
                          tile_rows, total_rows, apply_mask,
                          coef_sq, coef_abs):
    """Accumulate per-lane sum((x-y)^2), sum(|x-y|); finalize on last step."""
    step = pl.program_id(0)
    last = pl.num_programs(0) - 1

    @pl.when(step == 0)
    def _():
        sq_acc[...] = jnp.zeros_like(sq_acc)
        abs_acc[...] = jnp.zeros_like(abs_acc)

    # Upcast after the DMA (halves HBM traffic for sub-f32 inputs).
    diff = x_ref[...].astype(jnp.float32) - y_ref[...].astype(jnp.float32)

    if apply_mask:
        # Last block may be partial; rows past `total_rows` hold garbage.
        row = step * tile_rows + lax.broadcasted_iota(
            jnp.int32, (tile_rows, LANES), 0)
        diff = jnp.where(row < total_rows, diff, 0.0)

    # Per-lane partial sums: VPU adds across row-vregs + one sublane reduce.
    sq_acc[...] += jnp.sum(diff * diff, axis=0, keepdims=True)
    abs_acc[...] += jnp.sum(jnp.abs(diff), axis=0, keepdims=True)

    @pl.when(step == last)
    def _():
        # Single cross-lane reduce each (XLU, once per kernel), then the
        # compile-time-constant normalization + alpha mix -> (1, 1) scalar.
        sq_sum = jnp.sum(sq_acc[...], axis=1, keepdims=True)
        abs_sum = jnp.sum(abs_acc[...], axis=1, keepdims=True)
        out_ref[...] = coef_sq * sq_sum + coef_abs * abs_sum


def combined_loss(x, y, alpha=0.5, max_tile_rows=MAX_TILE_ROWS):
    assert x.shape == y.shape, "input and target must have the same shape"
    n_elems = x.size

    # Keep native dtype; flatten (free, row-major reshape).
    xf = jnp.ravel(x)
    yf = jnp.ravel(y)

    # Lane alignment: only pad when size % 128 != 0 (rare for NCHW tensors).
    rem = n_elems % LANES
    if rem:
        # TODO(synk): this lane pad still materializes a copy; a fully
        # copy-free ragged path would need 1-D blocks + lane masking in-kernel.
        pad = LANES - rem
        xf = jnp.pad(xf, (0, pad))
        yf = jnp.pad(yf, (0, pad))

    rows = xf.size // LANES
    x2d = xf.reshape(rows, LANES)
    y2d = yf.reshape(rows, LANES)

    # Big row-tile to amortize grid-step overhead; clipped to the full array
    # for small inputs (block == full dim is always legal).
    tile_rows = min(max_tile_rows, rows)
    grid = (pl.cdiv(rows, tile_rows),)
    apply_mask = (rows % tile_rows) != 0  # partial last block needs masking

    # Fold 1/N and the alpha mix into two compile-time constants.
    alpha_f = float(alpha)
    coef_sq = (1.0 - alpha_f) / float(n_elems)
    coef_abs = alpha_f / float(n_elems)

    kernel = functools.partial(
        _combined_loss_kernel,
        tile_rows=tile_rows,
        total_rows=rows,
        apply_mask=apply_mask,
        coef_sq=coef_sq,
        coef_abs=coef_abs,
    )

    out = pl.pallas_call(
        kernel,
        out_shape=jax.ShapeDtypeStruct((1, 1), jnp.float32),
        grid_spec=pltpu.PrefetchScalarGridSpec(
            num_scalar_prefetch=0,
            grid=grid,
            in_specs=[
                pl.BlockSpec((tile_rows, LANES), lambda i: (i, 0)),
                pl.BlockSpec((tile_rows, LANES), lambda i: (i, 0)),
            ],
            out_specs=pl.BlockSpec((1, 1), lambda i: (0, 0)),
            scratch_shapes=[
                pltpu.VMEM((1, LANES), jnp.float32),
                pltpu.VMEM((1, LANES), jnp.float32),
            ],
        ),
        compiler_params=pltpu.CompilerParams(
            dimension_semantics=("arbitrary",),
        ),
    )(x2d, y2d)

    return out[0, 0]


def combined_loss_ref(x, y, alpha=0.5):
    diff = x.astype(jnp.float32) - y.astype(jnp.float32)
    mse = jnp.mean(diff * diff)
    l1 = jnp.mean(jnp.abs(diff))
    return (1.0 - alpha) * mse + alpha * l1


if __name__ == "__main__":
    key = jax.random.PRNGKey(0)
    k1, k2, k3, k4 = jax.random.split(key, 4)

    # 1) Main case: NCHW float32, lane-aligned size (no pad, single big block).
    x = jax.random.normal(k1, (2, 4, 16, 16), dtype=jnp.float32)
    y = jax.random.normal(k2, (2, 4, 16, 16), dtype=jnp.float32)
    out = jax.block_until_ready(combined_loss(x, y, alpha=0.5))
    ref = combined_loss_ref(x, y, alpha=0.5)
    assert jnp.allclose(out, ref, rtol=1e-5, atol=1e-5), (out, ref)

    # 2) bf16 inputs: no wrapper cast, in-kernel upcast to f32.
    xb = x.astype(jnp.bfloat16)
    yb = y.astype(jnp.bfloat16)
    out_b = jax.block_until_ready(combined_loss(xb, yb, alpha=0.5))
    ref_b = combined_loss_ref(xb, yb, alpha=0.5)
    assert jnp.allclose(out_b, ref_b, rtol=1e-5, atol=1e-5), (out_b, ref_b)

    # 3) Ragged size + small tile to exercise the partial-block mask path and
    #    the multi-step accumulate -> in-kernel finalize.
    xr = jax.random.normal(k3, (2, 3, 20, 20), dtype=jnp.float32)
    yr = jax.random.normal(k4, (2, 3, 20, 20), dtype=jnp.float32)
    out_r = jax.block_until_ready(combined_loss(xr, yr, alpha=0.3,
                                                max_tile_rows=8))
    ref_r = combined_loss_ref(xr, yr, alpha=0.3)
    assert jnp.allclose(out_r, ref_r, rtol=1e-5, atol=1e-5), (out_r, ref_r)

    print("KERNEL_OK")
</pallas_src>

<mosaic_0001>
module attributes {stable_mosaic.version = 11 : i64} {
  func.func @_combined_loss_kernel(%arg0: i32, %arg1: memref<16x128xf32, #tpu.memory_space<vmem>>, %arg2: memref<16x128xf32, #tpu.memory_space<vmem>>, %arg3: memref<1x1xf32, #tpu.memory_space<vmem>>, %arg4: memref<1x128xf32, #tpu.memory_space<vmem>>, %arg5: memref<1x128xf32, #tpu.memory_space<vmem>>) attributes {dimension_semantics = [#tpu.dimension_semantics<arbitrary>], iteration_bounds = array<i64: 1>, scalar_prefetch = 0 : i64, scratch_operands = 2 : i64, tpu.core_type = #tpu.core_type<tc>, window_params = [{transform_indices = @transform_0, window_bounds = array<i64: 16, 128>}, {transform_indices = @transform_1, window_bounds = array<i64: 16, 128>}, {pipeline_mode = #tpu.pipeline_mode<synchronous>, transform_indices = @transform_2, window_bounds = array<i64: 1, 1>}]} {
    %c0_i32 = arith.constant 0 : i32
    %0 = arith.cmpi eq, %arg0, %c0_i32 : i32
    %1 = arith.extui %0 : i1 to i32
    %c0_i32_0 = arith.constant 0 : i32
    %2 = arith.cmpi ne, %1, %c0_i32_0 : i32
    scf.if %2 {
      %cst_15 = arith.constant 0.000000e+00 : f32
      %21 = vector.broadcast %cst_15 : f32 to vector<1x128xf32>
      %c0_16 = arith.constant 0 : index
      %c0_17 = arith.constant 0 : index
      %22 = vector.load %arg4[%c0_16, %c0_17] : memref<1x128xf32, #tpu.memory_space<vmem>>, vector<1x128xf32>
      tpu.vector_store %arg4[%c0_16, %c0_17], %21 {strides = array<i32>} : memref<1x128xf32, #tpu.memory_space<vmem>>, vector<1x128xf32>,
      %cst_18 = arith.constant 0.000000e+00 : f32
      %23 = vector.broadcast %cst_18 : f32 to vector<1x128xf32>
      %c0_19 = arith.constant 0 : index
      %c0_20 = arith.constant 0 : index
      %24 = vector.load %arg5[%c0_19, %c0_20] : memref<1x128xf32, #tpu.memory_space<vmem>>, vector<1x128xf32>
      tpu.vector_store %arg5[%c0_19, %c0_20], %23 {strides = array<i32>} : memref<1x128xf32, #tpu.memory_space<vmem>>, vector<1x128xf32>,
    } else {
    }
    %c0 = arith.constant 0 : index
    %c0_1 = arith.constant 0 : index
    %3 = vector.load %arg1[%c0, %c0_1] : memref<16x128xf32, #tpu.memory_space<vmem>>, vector<16x128xf32>
    %c0_2 = arith.constant 0 : index
    %c0_3 = arith.constant 0 : index
    %4 = vector.load %arg2[%c0_2, %c0_3] : memref<16x128xf32, #tpu.memory_space<vmem>>, vector<16x128xf32>
    %5 = arith.subf %3, %4 : vector<16x128xf32>
    %c0_4 = arith.constant 0 : index
    %c0_5 = arith.constant 0 : index
    %6 = vector.load %arg4[%c0_4, %c0_5] : memref<1x128xf32, #tpu.memory_space<vmem>>, vector<1x128xf32>
    %7 = arith.mulf %5, %5 : vector<16x128xf32>
    %cst = arith.constant dense<0.000000e+00> : vector<128xf32>
    %8 = vector.multi_reduction <add>, %7, %cst [0] : vector<16x128xf32> to vector<128xf32>
    %9 = vector.shape_cast %8 : vector<128xf32> to vector<1x128xf32>
    %10 = arith.addf %6, %9 : vector<1x128xf32>
    %c0_6 = arith.constant 0 : index
    %c0_7 = arith.constant 0 : index
    %11 = vector.load %arg4[%c0_6, %c0_7] : memref<1x128xf32, #tpu.memory_space<vmem>>, vector<1x128xf32>
    tpu.vector_store %arg4[%c0_6, %c0_7], %10 {strides = array<i32>} : memref<1x128xf32, #tpu.memory_space<vmem>>, vector<1x128xf32>,
    %c0_8 = arith.constant 0 : index
    %c0_9 = arith.constant 0 : index
    %12 = vector.load %arg5[%c0_8, %c0_9] : memref<1x128xf32, #tpu.memory_space<vmem>>, vector<1x128xf32>
    %13 = math.absf %5 : vector<16x128xf32>
    %cst_10 = arith.constant dense<0.000000e+00> : vector<128xf32>
    %14 = vector.multi_reduction <add>, %13, %cst_10 [0] : vector<16x128xf32> to vector<128xf32>
    %15 = vector.shape_cast %14 : vector<128xf32> to vector<1x128xf32>
    %16 = arith.addf %12, %15 : vector<1x128xf32>
    %c0_11 = arith.constant 0 : index
    %c0_12 = arith.constant 0 : index
    %17 = vector.load %arg5[%c0_11, %c0_12] : memref<1x128xf32, #tpu.memory_space<vmem>>, vector<1x128xf32>
    tpu.vector_store %arg5[%c0_11, %c0_12], %16 {strides = array<i32>} : memref<1x128xf32, #tpu.memory_space<vmem>>, vector<1x128xf32>,
    %c0_i32_13 = arith.constant 0 : i32
    %18 = arith.cmpi eq, %arg0, %c0_i32_13 : i32
    %19 = arith.extui %18 : i1 to i32
    %c0_i32_14 = arith.constant 0 : i32
    %20 = arith.cmpi ne, %19, %c0_i32_14 : i32
    scf.if %20 {
      %c0_15 = arith.constant 0 : index
      %c0_16 = arith.constant 0 : index
      %21 = vector.load %arg4[%c0_15, %c0_16] : memref<1x128xf32, #tpu.memory_space<vmem>>, vector<1x128xf32>
      %cst_17 = arith.constant dense<0.000000e+00> : vector<1xf32>
      %22 = vector.multi_reduction <add>, %21, %cst_17 [1] : vector<1x128xf32> to vector<1xf32>
      %23 = vector.shape_cast %22 : vector<1xf32> to vector<1x1xf32>
      %c0_18 = arith.constant 0 : index
      %c0_19 = arith.constant 0 : index
      %24 = vector.load %arg5[%c0_18, %c0_19] : memref<1x128xf32, #tpu.memory_space<vmem>>, vector<1x128xf32>
      %cst_20 = arith.constant dense<0.000000e+00> : vector<1xf32>
      %25 = vector.multi_reduction <add>, %24, %cst_20 [1] : vector<1x128xf32> to vector<1xf32>
      %26 = vector.shape_cast %25 : vector<1xf32> to vector<1x1xf32>
      %cst_21 = arith.constant 2.44140625E-4 : f32
      %27 = vector.broadcast %cst_21 : f32 to vector<1x1xf32>
      %28 = arith.mulf %27, %23 : vector<1x1xf32>
      %cst_22 = arith.constant 2.44140625E-4 : f32
      %29 = vector.broadcast %cst_22 : f32 to vector<1x1xf32>
      %30 = arith.mulf %29, %26 : vector<1x1xf32>
      %31 = arith.addf %28, %30 : vector<1x1xf32>
      %c0_23 = arith.constant 0 : index
      %c0_24 = arith.constant 0 : index
      %32 = vector.load %arg3[%c0_23, %c0_24] : memref<1x1xf32, #tpu.memory_space<vmem>>, vector<1x1xf32>
      tpu.vector_store %arg3[%c0_23, %c0_24], %31 {strides = array<i32>} : memref<1x1xf32, #tpu.memory_space<vmem>>, vector<1x1xf32>,
    } else {
    }
    return
  }
  func.func @transform_0(%arg0: i32) -> (i32, i32) {
    %c0_i32 = arith.constant 0 : i32
    %c0_i32_0 = arith.constant 0 : i32
    return %arg0, %c0_i32 : i32, i32
  }
  func.func @transform_1(%arg0: i32) -> (i32, i32) {
    %c0_i32 = arith.constant 0 : i32
    %c0_i32_0 = arith.constant 0 : i32
    return %arg0, %c0_i32 : i32, i32
  }
  func.func @transform_2(%arg0: i32) -> (i32, i32) {
    %c0_i32 = arith.constant 0 : i32
    %c0_i32_0 = arith.constant 0 : i32
    %c0_i32_1 = arith.constant 0 : i32
    return %c0_i32, %c0_i32_0 : i32, i32
  }
}

</mosaic_0001>

<bundles_post_ra>
// kernel: tpu_custom_call.1
= control target key start
LH: loop header
LB: loop body
LE: loop exit
PB: predicated region body
PF: predicated region fallthrough
CT: control target
= control target key end

     0   :  { %7 = vsyncpa [#allocation5], 0  ;;  %s244_s0 = inlined_call_operand.hbm [shape: f32[16,128], index: 0, kind: input, shape index: {}]   ;;  %s245_s1 = inlined_call_operand.hbm [shape: f32[16,128], index: 1, kind: input, shape index: {}]   ;;  %s246_s2 = inlined_call_operand.hbm [shape: f32[1,1], index: 2, kind: output, shape index: {}]  }
   0x1   :  { %8 = vsyncpa [#allocation8], 0 }
   0x2   :  { %9 = vsyncpa [#allocation6], 0  ;;  %s187_s9 = smov [#allocation4]   ;;  %s115_s13 = scalar_lea.hbm %s244_s0, 256 }
   0x3   :  { %s15_s10 = sshll.u32 %s187_s9, 4  ;;  %p116_p0 = scmp.ne.s32.totalorder %s244_s0, %s115_s13  ;;  %s16_s10 = int_to_ptr.vmem [resolvable:$true] %s15_s10 }
   0x4   :  { %p119_p1 = scmp.lt.u32.totalorder %s115_s13, %s244_s0 }
   0x6   :  { %p121_p2 = pnand %p119_p1, %p116_p0 }
   0x8   :  { %124 = shalt.err (!%p121_p2)
}
   0x9   :  { %s125_s18 = scalar_lea.vmem %s16_s10, 256  ;;  %p130_p4 = scmp.lt.s32.totalorder %s16_s10, %s16_s10 }
   0xa   :  { %p126_p3 = scmp.ne.s32.totalorder %s16_s10, %s125_s18  ;;  %p131_p5 = scmp.lt.s32.totalorder %s125_s18, %s125_s18 }
   0xc   :  { %p132_p6 = por %p131_p5, %p130_p4 }
   0xe   :  { %p133_p7 = pnand %p132_p6, %p126_p3 }
  0x10   :  { %136 = shalt.err (!%p133_p7)
}
  0x11   :  { %s188_s19 = smov 128   ;;  %s189_s20 = smov 8  }
  0x12   :  { %21 = dma.hbm_to_vmem [thread:$0]  %s244_s0, 256, %s16_s10, [#allocation5], %s188_s19, %s188_s19, %s189_s20  }
  0x13   :  { %s190_s23 = smov [#allocation7]   ;;  %s137_s27 = scalar_lea.hbm %s245_s1, 256 }
  0x14   :  { %s27_s24 = sshll.u32 %s190_s23, 4  ;;  %p138_p8 = scmp.ne.s32.totalorder %s245_s1, %s137_s27  ;;  %s28_s24 = int_to_ptr.vmem [resolvable:$true] %s27_s24 }
  0x15   :  { %p141_p9 = scmp.lt.u32.totalorder %s137_s27, %s245_s1 }
  0x17   :  { %p143_p10 = pnand %p141_p9, %p138_p8 }
  0x19   :  { %146 = shalt.err (!%p143_p10)
}
  0x1a   :  { %s147_s4 = scalar_lea.vmem %s28_s24, 256  ;;  %p152_p12 = scmp.lt.s32.totalorder %s28_s24, %s28_s24 }
  0x1b   :  { %p148_p11 = scmp.ne.s32.totalorder %s28_s24, %s147_s4  ;;  %p153_p13 = scmp.lt.s32.totalorder %s147_s4, %s147_s4 }
  0x1d   :  { %p154_p0 = por %p153_p13, %p152_p12 }
  0x1f   :  { %p155_p1 = pnand %p154_p0, %p148_p11 }
  0x21   :  { %158 = shalt.err (!%p155_p1)
}
  0x22   :  { %33 = dma.hbm_to_vmem [thread:$0]  %s245_s1, 256, %s28_s24, [#allocation8], %s188_s19, %s188_s19, %s189_s20  }
  0x23   :  { %181 = dma.done.wait [#allocation5], 256  }
  0x24   :  { %182 = vsyncadd [#allocation5], 4294967040 }
  0x25   :  { %183 = dma.done.wait [#allocation8], 256  }
  0x26   :  { %184 = vsyncadd [#allocation8], 4294967040  ;;  %v191_v0 = vmov 0.0   ;;  %v46_v1 = vld [vmem:[#allocation4] sm:$0xff]  ;;  %v47_v2 = vld [vmem:[#allocation4 + $0x8] sm:$0xff]  ;;  %vm80_vm0 = vcmask 1040384  }
  0x27   :  { %44 = vst [vmem:[#allocation2] sm:$0x1] %v191_v0  ;;  %45 = vst [vmem:[#allocation3] sm:$0x1] %v191_v0  ;;  %v48_v3 = vld [vmem:[#allocation7] sm:$0xff]  ;;  %v49_v4 = vld [vmem:[#allocation7 + $0x8] sm:$0xff] }
  0x28   :  { %v50_v5 = vsub.f32 %v46_v1, %v48_v3  ;;  %v51_v6 = vsub.f32 %v47_v2, %v49_v4  ;;  %s192_s1 = smov [#allocation9]   ;;  %vm91_vm1 = vcmask 0  }
  0x29   :  { %s99_s6 = sshll.u32 %s192_s1, 4  ;;  %s100_s6 = int_to_ptr.vmem [resolvable:$true] %s99_s6 }
  0x2a   :  { %v53_v7 = vmul.f32 %v50_v5, %v50_v5  ;;  %v65_v8 = vand.u32 2147483647, %v50_v5  ;;  %v54_v9 = vmul.f32 %v51_v6, %v51_v6  ;;  %v66_v10 = vand.u32 2147483647, %v51_v6  ;;  %s159_s7 = scalar_lea.vmem %s100_s6, 16  ;;  %s163_s8 = scalar_lea.vmem %s100_s6, 32 }
  0x2b   :  { %p160_p2 = scmp.ne.s32.totalorder %s100_s6, %s159_s7  ;;  %p164_p3 = scmp.lt.s32.totalorder %s100_s6, %s100_s6 }
  0x2c   :  { %v55_v11 = vadd.f32 %v54_v9, %v53_v7  ;;  %v67_v12 = vadd.f32 %v66_v10, %v65_v8  ;;  %p165_p4 = scmp.lt.s32.totalorder %s163_s8, %s159_s7 }
  0x2e   :  { %v56_v13 = vrot.slane %v55_v11, 4  ;;  %v68_v14 = vrot.slane %v67_v12, 4  ;;  %v52_v23 = vld [vmem:[#allocation2] sm:$0x1]  ;;  %v64_v24 = vld [vmem:[#allocation3] sm:$0x1]  ;;  %p166_p5 = por %p165_p4, %p164_p3 }
  0x30   :  { %v57_v15 = vadd.f32 %v56_v13, %v55_v11  ;;  %v69_v16 = vadd.f32 %v68_v14, %v67_v12  ;;  %p167_p6 = pnand %p166_p5, %p160_p2 }
  0x32   :  { %v58_v17 = vrot.slane %v57_v15, 2  ;;  %v70_v18 = vrot.slane %v69_v16, 2 }
  0x34   :  { %v59_v19 = vadd.f32 %v58_v17, %v57_v15  ;;  %v71_v20 = vadd.f32 %v70_v18, %v69_v16 }
  0x36   :  { %v60_v21 = vrot.slane %v59_v19, 1  ;;  %v72_v22 = vrot.slane %v71_v20, 1 }
  0x38   :  { %v61_v25 = vadd.f32 %v60_v21, %v59_v19  ;;  %v73_v26 = vadd.f32 %v72_v22, %v71_v20 }
  0x3a   :  { %v62_v27 = vadd.f32 %v61_v25, %v52_v23  ;;  %v74_v28 = vadd.f32 %v73_v26, %v64_v24 }
  0x3c   :  { %63 = vst [vmem:[#allocation2] sm:$0x1] %v62_v27  ;;  %75 = vst [vmem:[#allocation3] sm:$0x1] %v74_v28 }
  0x43   :  { %v79_v29 = vld [vmem:[#allocation2] sm:$0x1]  ;;  %v84_v30 = vld [vmem:[#allocation3] sm:$0x1] }
  0x44   :  { %v81_v31 = vsel %vm80_vm0, %v79_v29, 0.0  ;;  %v85_v32 = vsel %vm80_vm0, %v84_v30, 0.0 }
  0x45   :  { %82 = vadd.xlane.f32.xlu0 %v81_v31 }
  0x49   :  { %86 = vadd.xlane.f32.xlu0 %v85_v32 }
  0xd2   :  { %v83_v33 = vpop.xlane.xlu0 %82 }
  0xd3   :  { %v88_v35 = vmul.f32 0.00024414063, %v83_v33 }
  0xd6   :  { %v87_v34 = vpop.xlane.xlu0 %86 }
  0xd7   :  { %v89_v36 = vmul.f32 0.00024414063, %v87_v34 }
  0xd9   :  { %v90_v37 = vadd.f32 %v89_v36, %v88_v35 }
  0xdb   :  { %92 = vst.msk [vmem:[#allocation9] sm:$0x1] %vm91_vm1, %v90_v37 }
  0xdc   :  { %170 = shalt.err (!%p167_p6)
}
  0xdd   :  { %s171_s11 = scalar_lea.hbm %s246_s2, 16 }
  0xde   :  { %p172_p7 = scmp.ne.s32.totalorder %s246_s2, %s171_s11  ;;  %p175_p8 = scmp.lt.u32.totalorder %s171_s11, %s246_s2 }
  0xe0   :  { %p177_p9 = pnand %p175_p8, %p172_p7 }
  0xe2   :  { %180 = shalt.err (!%p177_p9)
}
  0xe3   :  { %102 = dma.vmem_to_hbm [thread:$0]  %s100_s6, 16, %s246_s2, [#allocation6]  }
  0xe4   :  { %185 = dma.done.wait [#allocation6], 16  }
  0xe5   :  { %186 = vsyncadd [#allocation6], 4294967280 }
  0xe6   :  { %106 = vsyncpa [#allocation5], 1 }
  0xe7   :  { %107 = vsyncpa [#allocation8], 1 }
  0xe8   :  { %108 = vsyncpa [#allocation6], 1 }

</bundles_post_ra>
